<compile_context>
chip_gen: v5e
topology: v5e:2x2
jax: 0.10.0
libtpu: 0.0.40
codegen_flags: <defaults>
</compile_context>

<pallas_src>
import functools

import jax
import jax.numpy as jnp
from jax.experimental import pallas as pl
from jax.experimental.pallas import tpu as pltpu


def rnn_kernel(x_ref, w_ih_e_ref, w_hh_e_ref, b_e_ref,
               w_dec_ref, b_d_ref, w_dn_ref, b_dn_ref,
               out_ref, *, hidden, predict_length):
    H = hidden
    S, B, _ = x_ref.shape

    w_ih_e = w_ih_e_ref[...]    # (1, 4H)   encoder W_ih^T (input size 1)
    w_hh_e = w_hh_e_ref[...]    # (H, 4H)   encoder W_hh^T
    b_e = b_e_ref[...]          # (1, 4H)   encoder b_ih + b_hh
    w_dec = w_dec_ref[...]      # (2H, 4H)  stacked [W_ih_dec^T ; W_hh_dec^T]
    b_d = b_d_ref[...]          # (1, 4H)   decoder b_ih + b_hh
    w_dn = w_dn_ref[...]        # (1, H)    dense weight (out_features = 1)
    b_dn = b_dn_ref[...]        # (1, 1)

    def activate(gates, c):
        # PyTorch LSTMCell gate order: i, f, g, o.
        # Full-vreg EUP passes, then lane slices (cheaper than 4 sub-vreg EUP).
        sig = jax.nn.sigmoid(gates)
        tnh = jnp.tanh(gates)
        i = sig[:, 0 * H:1 * H]
        f = sig[:, 1 * H:2 * H]
        g = tnh[:, 2 * H:3 * H]
        o = sig[:, 3 * H:4 * H]
        c_new = f * c + i * g
        h_new = o * jnp.tanh(c_new)
        return h_new, c_new

    # ---- encoder pass over the sequence (zero-initialized state) ----
    h = jnp.zeros((B, H), jnp.float32)
    c = jnp.zeros((B, H), jnp.float32)
    for t in range(S):                                   # static trip count
        xt = x_ref[t]                                    # (B, 1) leading-axis read
        gates = (xt * w_ih_e
                 + jnp.dot(h, w_hh_e, preferred_element_type=jnp.float32)
                 + b_e)
        h, c = activate(gates, c)

    # Loop-invariant re-encode recurrent term: the re-encode cell always uses
    # the ORIGINAL (h, c), so h @ W_hh_enc + b_enc is constant for all steps.
    enc_h_gates = jnp.dot(h, w_hh_e, preferred_element_type=jnp.float32) + b_e

    # ---- decode loop ----
    xcur = h
    nh, nc = h, c
    cols = []
    for _ in range(predict_length):                      # static trip count
        # Decoder cell: one fused (B, 2H) x (2H, 4H) matmul.
        zin = jnp.concatenate([xcur, nh], axis=1)        # (B, 2H)
        d_gates = jnp.dot(zin, w_dec,
                          preferred_element_type=jnp.float32) + b_d
        nh, nc = activate(d_gates, nc)

        # Dense head on the decoder *input* (matches the PyTorch forward).
        y = jnp.sum(xcur * w_dn, axis=1, keepdims=True) + b_dn   # (B, 1)
        cols.append(y)

        # Re-encode y with the original (h, c); only the h output is needed.
        r_gates = y * w_ih_e + enc_h_gates
        xcur, _ = activate(r_gates, c)

    # Single aggregated store instead of predict_length masked 1-lane stores.
    out_ref[...] = jnp.concatenate(cols, axis=1)         # (B, predict_length)


def rnn_forward(x, params, hidden, predict_length):
    """x: (batch, seq) float32 -> (batch, predict_length) float32."""
    B, S = x.shape
    B_pad = max(8, ((B + 7) // 8) * 8)                   # fill sublane height

    # Padding / layout plumbing stays in the wrapper.
    x_pad = jnp.zeros((B_pad, S), jnp.float32).at[:B, :].set(
        x.astype(jnp.float32))
    x_sb1 = jnp.transpose(x_pad)[:, :, None]             # (S, B_pad, 1)

    kernel = functools.partial(rnn_kernel, hidden=hidden,
                               predict_length=predict_length)
    vmem = pl.BlockSpec(memory_space=pltpu.MemorySpace.VMEM)
    args = (x_sb1,
            params["w_ih_enc_t"], params["w_hh_enc_t"], params["b_enc"],
            params["w_dec_t"], params["b_dec"],
            params["w_dense"], params["b_dense"])
    out_pad = pl.pallas_call(
        kernel,
        out_shape=jax.ShapeDtypeStruct((B_pad, predict_length), jnp.float32),
        in_specs=[vmem] * len(args),
        out_specs=vmem,
    )(*args)
    return out_pad[:B, :]


def init_params(key, hidden):
    """Deterministic params matching PyTorch shapes (uniform(-1/sqrt(H), 1/sqrt(H)))."""
    H = hidden
    bound = 1.0 / (H ** 0.5)
    keys = jax.random.split(key, 10)

    def u(kk, shape):
        return jax.random.uniform(kk, shape, jnp.float32, -bound, bound)

    w_ih_enc = u(keys[0], (4 * H, 1))
    w_hh_enc = u(keys[1], (4 * H, H))
    b_ih_enc = u(keys[2], (4 * H,))
    b_hh_enc = u(keys[3], (4 * H,))
    w_ih_dec = u(keys[4], (4 * H, H))
    w_hh_dec = u(keys[5], (4 * H, H))
    b_ih_dec = u(keys[6], (4 * H,))
    b_hh_dec = u(keys[7], (4 * H,))
    w_dense = u(keys[8], (1, H))
    b_dense = u(keys[9], (1,))
    return dict(
        w_ih_enc_t=w_ih_enc.T,                                # (1, 4H)
        w_hh_enc_t=w_hh_enc.T,                                # (H, 4H)
        b_enc=(b_ih_enc + b_hh_enc)[None, :],                 # (1, 4H)
        # Stacked decoder weight: one (2H, 4H) matmul instead of two.
        w_dec_t=jnp.concatenate([w_ih_dec.T, w_hh_dec.T], axis=0),  # (2H, 4H)
        b_dec=(b_ih_dec + b_hh_dec)[None, :],                 # (1, 4H)
        w_dense=w_dense,                                      # (1, H)
        b_dense=b_dense[None, :],                             # (1, 1)
    )


def rnn_forward_ref(x, params, hidden, predict_length):
    """Pure-JAX reference mirroring the PyTorch forward (for correctness check)."""
    H = hidden
    w_ih_dec_t = params["w_dec_t"][:H, :]
    w_hh_dec_t = params["w_dec_t"][H:, :]

    def cell(x_gates, h, c, w_hh_t, b):
        gates = x_gates + h @ w_hh_t + b
        i = jax.nn.sigmoid(gates[:, 0 * H:1 * H])
        f = jax.nn.sigmoid(gates[:, 1 * H:2 * H])
        g = jnp.tanh(gates[:, 2 * H:3 * H])
        o = jax.nn.sigmoid(gates[:, 3 * H:4 * H])
        c2 = f * c + i * g
        return o * jnp.tanh(c2), c2

    B, S = x.shape
    h = jnp.zeros((B, H), jnp.float32)
    c = jnp.zeros((B, H), jnp.float32)
    for t in range(S):
        h, c = cell(x[:, t:t + 1] * params["w_ih_enc_t"], h, c,
                    params["w_hh_enc_t"], params["b_enc"])
    xcur, nh, nc = h, h, c
    cols = []
    for _ in range(predict_length):
        nh, nc = cell(xcur @ w_ih_dec_t, nh, nc, w_hh_dec_t, params["b_dec"])
        y = (jnp.sum(xcur * params["w_dense"], axis=1, keepdims=True)
             + params["b_dense"])
        cols.append(y)
        xcur, _ = cell(y * params["w_ih_enc_t"], h, c,
                       params["w_hh_enc_t"], params["b_enc"])
    return jnp.concatenate(cols, axis=1)


if __name__ == "__main__":
    HIDDEN = 32        # 4*H = 128 -> one full lane row of gate pre-activations
    BATCH = 4          # padded to 8 sublanes inside the wrapper
    SEQ = 8
    PRED = 4

    key = jax.random.PRNGKey(0)
    kx, kp = jax.random.split(key)
    x = jax.random.normal(kx, (BATCH, SEQ), jnp.float32)
    params = init_params(kp, HIDDEN)

    out = rnn_forward(x, params, HIDDEN, PRED)
    out = jax.block_until_ready(out)
    assert out.shape == (BATCH, PRED) and out.dtype == jnp.float32

    ref = rnn_forward_ref(x, params, HIDDEN, PRED)
    assert jnp.allclose(out, ref, rtol=1e-3, atol=1e-3), (out, ref)

    # TODO(synk): training path (Adam step / neg loss / .cuda-.cpu mode flags)
    # is host-side PyTorch machinery, not part of the forward pass kernel.
    print("KERNEL_OK")
</pallas_src>

<mosaic_0001>
module attributes {stable_mosaic.version = 11 : i64} {
  func.func @rnn_kernel(%arg0: memref<8x8x1xf32, #tpu.memory_space<vmem>>, %arg1: memref<1x128xf32, #tpu.memory_space<vmem>>, %arg2: memref<32x128xf32, #tpu.memory_space<vmem>>, %arg3: memref<1x128xf32, #tpu.memory_space<vmem>>, %arg4: memref<64x128xf32, #tpu.memory_space<vmem>>, %arg5: memref<1x128xf32, #tpu.memory_space<vmem>>, %arg6: memref<1x32xf32, #tpu.memory_space<vmem>>, %arg7: memref<1x1xf32, #tpu.memory_space<vmem>>, %arg8: memref<8x4xf32, #tpu.memory_space<vmem>>) attributes {dimension_semantics = [], scalar_prefetch = 0 : i64, scratch_operands = 0 : i64, tpu.core_type = #tpu.core_type<tc>} {
    %c0 = arith.constant 0 : index
    %c0_0 = arith.constant 0 : index
    %0 = vector.load %arg1[%c0, %c0_0] : memref<1x128xf32, #tpu.memory_space<vmem>>, vector<1x128xf32>
    %c0_1 = arith.constant 0 : index
    %c0_2 = arith.constant 0 : index
    %1 = vector.load %arg2[%c0_1, %c0_2] : memref<32x128xf32, #tpu.memory_space<vmem>>, vector<32x128xf32>
    %c0_3 = arith.constant 0 : index
    %c0_4 = arith.constant 0 : index
    %2 = vector.load %arg3[%c0_3, %c0_4] : memref<1x128xf32, #tpu.memory_space<vmem>>, vector<1x128xf32>
    %c0_5 = arith.constant 0 : index
    %c0_6 = arith.constant 0 : index
    %3 = vector.load %arg6[%c0_5, %c0_6] : memref<1x32xf32, #tpu.memory_space<vmem>>, vector<1x32xf32>
    %c0_7 = arith.constant 0 : index
    %c0_8 = arith.constant 0 : index
    %4 = vector.load %arg7[%c0_7, %c0_8] : memref<1x1xf32, #tpu.memory_space<vmem>>, vector<1x1xf32>
    %cst = arith.constant 0.000000e+00 : f32
    %5 = vector.broadcast %cst : f32 to vector<8x32xf32>
    %cst_9 = arith.constant 0.000000e+00 : f32
    %6 = vector.broadcast %cst_9 : f32 to vector<8x32xf32>
    %c0_10 = arith.constant 0 : index
    %c0_11 = arith.constant 0 : index
    %c0_12 = arith.constant 0 : index
    %7 = vector.load %arg0[%c0_10, %c0_11, %c0_12] : memref<8x8x1xf32, #tpu.memory_space<vmem>>, vector<1x8x1xf32>
    %8 = vector.shape_cast %7 : vector<1x8x1xf32> to vector<8x1xf32>
    %9 = vector.broadcast %8 : vector<8x1xf32> to vector<8x128xf32>
    %10 = vector.broadcast %0 : vector<1x128xf32> to vector<8x128xf32>
    %11 = arith.mulf %9, %10 : vector<8x128xf32>
    %cst_13 = arith.constant dense<0.000000e+00> : vector<8x128xf32>
    %12 = tpu.matmul %5, %1, %cst_13 {dimension_numbers = #tpu.dot_dimension_numbers<[1], [0], [0], [1], [0, 0, 1, 1], [], []>} : vector<8x32xf32>, vector<32x128xf32>, vector<8x128xf32> -> vector<8x128xf32>
    %13 = arith.addf %11, %12 : vector<8x128xf32>
    %14 = vector.broadcast %2 : vector<1x128xf32> to vector<8x128xf32>
    %15 = arith.addf %13, %14 : vector<8x128xf32>
    %16 = arith.negf %15 : vector<8x128xf32>
    %17 = math.exp %16 : vector<8x128xf32>
    %cst_14 = arith.constant 1.000000e+00 : f32
    %18 = vector.broadcast %cst_14 : f32 to vector<8x128xf32>
    %19 = arith.addf %18, %17 : vector<8x128xf32>
    %20 = arith.divf %18, %19 : vector<8x128xf32>
    %21 = math.tanh %15 : vector<8x128xf32>
    %22 = vector.extract_strided_slice %20 {offsets = [0, 0], sizes = [8, 32], strides = [1, 1]} : vector<8x128xf32> to vector<8x32xf32>
    %23 = vector.extract_strided_slice %20 {offsets = [0, 32], sizes = [8, 32], strides = [1, 1]} : vector<8x128xf32> to vector<8x32xf32>
    %24 = vector.extract_strided_slice %21 {offsets = [0, 64], sizes = [8, 32], strides = [1, 1]} : vector<8x128xf32> to vector<8x32xf32>
    %25 = vector.extract_strided_slice %20 {offsets = [0, 96], sizes = [8, 32], strides = [1, 1]} : vector<8x128xf32> to vector<8x32xf32>
    %26 = arith.mulf %23, %6 : vector<8x32xf32>
    %27 = arith.mulf %22, %24 : vector<8x32xf32>
    %28 = arith.addf %26, %27 : vector<8x32xf32>
    %29 = math.tanh %28 : vector<8x32xf32>
    %30 = arith.mulf %25, %29 : vector<8x32xf32>
    %c1 = arith.constant 1 : index
    %c0_15 = arith.constant 0 : index
    %c0_16 = arith.constant 0 : index
    %31 = vector.load %arg0[%c1, %c0_15, %c0_16] : memref<8x8x1xf32, #tpu.memory_space<vmem>>, vector<1x8x1xf32>
    %32 = vector.shape_cast %31 : vector<1x8x1xf32> to vector<8x1xf32>
    %33 = vector.broadcast %32 : vector<8x1xf32> to vector<8x128xf32>
    %34 = vector.broadcast %0 : vector<1x128xf32> to vector<8x128xf32>
    %35 = arith.mulf %33, %34 : vector<8x128xf32>
    %cst_17 = arith.constant dense<0.000000e+00> : vector<8x128xf32>
    %36 = tpu.matmul %30, %1, %cst_17 {dimension_numbers = #tpu.dot_dimension_numbers<[1], [0], [0], [1], [0, 0, 1, 1], [], []>} : vector<8x32xf32>, vector<32x128xf32>, vector<8x128xf32> -> vector<8x128xf32>
    %37 = arith.addf %35, %36 : vector<8x128xf32>
    %38 = vector.broadcast %2 : vector<1x128xf32> to vector<8x128xf32>
    %39 = arith.addf %37, %38 : vector<8x128xf32>
    %40 = arith.negf %39 : vector<8x128xf32>
    %41 = math.exp %40 : vector<8x128xf32>
    %cst_18 = arith.constant 1.000000e+00 : f32
    %42 = vector.broadcast %cst_18 : f32 to vector<8x128xf32>
    %43 = arith.addf %42, %41 : vector<8x128xf32>
    %44 = arith.divf %42, %43 : vector<8x128xf32>
    %45 = math.tanh %39 : vector<8x128xf32>
    %46 = vector.extract_strided_slice %44 {offsets = [0, 0], sizes = [8, 32], strides = [1, 1]} : vector<8x128xf32> to vector<8x32xf32>
    %47 = vector.extract_strided_slice %44 {offsets = [0, 32], sizes = [8, 32], strides = [1, 1]} : vector<8x128xf32> to vector<8x32xf32>
    %48 = vector.extract_strided_slice %45 {offsets = [0, 64], sizes = [8, 32], strides = [1, 1]} : vector<8x128xf32> to vector<8x32xf32>
    %49 = vector.extract_strided_slice %44 {offsets = [0, 96], sizes = [8, 32], strides = [1, 1]} : vector<8x128xf32> to vector<8x32xf32>
    %50 = arith.mulf %47, %28 : vector<8x32xf32>
    %51 = arith.mulf %46, %48 : vector<8x32xf32>
    %52 = arith.addf %50, %51 : vector<8x32xf32>
    %53 = math.tanh %52 : vector<8x32xf32>
    %54 = arith.mulf %49, %53 : vector<8x32xf32>
    %c2 = arith.constant 2 : index
    %c0_19 = arith.constant 0 : index
    %c0_20 = arith.constant 0 : index
    %55 = vector.load %arg0[%c2, %c0_19, %c0_20] : memref<8x8x1xf32, #tpu.memory_space<vmem>>, vector<1x8x1xf32>
    %56 = vector.shape_cast %55 : vector<1x8x1xf32> to vector<8x1xf32>
    %57 = vector.broadcast %56 : vector<8x1xf32> to vector<8x128xf32>
    %58 = vector.broadcast %0 : vector<1x128xf32> to vector<8x128xf32>
    %59 = arith.mulf %57, %58 : vector<8x128xf32>
    %cst_21 = arith.constant dense<0.000000e+00> : vector<8x128xf32>
    %60 = tpu.matmul %54, %1, %cst_21 {dimension_numbers = #tpu.dot_dimension_numbers<[1], [0], [0], [1], [0, 0, 1, 1], [], []>} : vector<8x32xf32>, vector<32x128xf32>, vector<8x128xf32> -> vector<8x128xf32>
    %61 = arith.addf %59, %60 : vector<8x128xf32>
    %62 = vector.broadcast %2 : vector<1x128xf32> to vector<8x128xf32>
    %63 = arith.addf %61, %62 : vector<8x128xf32>
    %64 = arith.negf %63 : vector<8x128xf32>
    %65 = math.exp %64 : vector<8x128xf32>
    %cst_22 = arith.constant 1.000000e+00 : f32
    %66 = vector.broadcast %cst_22 : f32 to vector<8x128xf32>
    %67 = arith.addf %66, %65 : vector<8x128xf32>
    %68 = arith.divf %66, %67 : vector<8x128xf32>
    %69 = math.tanh %63 : vector<8x128xf32>
    %70 = vector.extract_strided_slice %68 {offsets = [0, 0], sizes = [8, 32], strides = [1, 1]} : vector<8x128xf32> to vector<8x32xf32>
    %71 = vector.extract_strided_slice %68 {offsets = [0, 32], sizes = [8, 32], strides = [1, 1]} : vector<8x128xf32> to vector<8x32xf32>
    %72 = vector.extract_strided_slice %69 {offsets = [0, 64], sizes = [8, 32], strides = [1, 1]} : vector<8x128xf32> to vector<8x32xf32>
    %73 = vector.extract_strided_slice %68 {offsets = [0, 96], sizes = [8, 32], strides = [1, 1]} : vector<8x128xf32> to vector<8x32xf32>
    %74 = arith.mulf %71, %52 : vector<8x32xf32>
    %75 = arith.mulf %70, %72 : vector<8x32xf32>
    %76 = arith.addf %74, %75 : vector<8x32xf32>
    %77 = math.tanh %76 : vector<8x32xf32>
    %78 = arith.mulf %73, %77 : vector<8x32xf32>
    %c3 = arith.constant 3 : index
    %c0_23 = arith.constant 0 : index
    %c0_24 = arith.constant 0 : index
    %79 = vector.load %arg0[%c3, %c0_23, %c0_24] : memref<8x8x1xf32, #tpu.memory_space<vmem>>, vector<1x8x1xf32>
    %80 = vector.shape_cast %79 : vector<1x8x1xf32> to vector<8x1xf32>
    %81 = vector.broadcast %80 : vector<8x1xf32> to vector<8x128xf32>
    %82 = vector.broadcast %0 : vector<1x128xf32> to vector<8x128xf32>
    %83 = arith.mulf %81, %82 : vector<8x128xf32>
    %cst_25 = arith.constant dense<0.000000e+00> : vector<8x128xf32>
    %84 = tpu.matmul %78, %1, %cst_25 {dimension_numbers = #tpu.dot_dimension_numbers<[1], [0], [0], [1], [0, 0, 1, 1], [], []>} : vector<8x32xf32>, vector<32x128xf32>, vector<8x128xf32> -> vector<8x128xf32>
    %85 = arith.addf %83, %84 : vector<8x128xf32>
    %86 = vector.broadcast %2 : vector<1x128xf32> to vector<8x128xf32>
    %87 = arith.addf %85, %86 : vector<8x128xf32>
    %88 = arith.negf %87 : vector<8x128xf32>
    %89 = math.exp %88 : vector<8x128xf32>
    %cst_26 = arith.constant 1.000000e+00 : f32
    %90 = vector.broadcast %cst_26 : f32 to vector<8x128xf32>
    %91 = arith.addf %90, %89 : vector<8x128xf32>
    %92 = arith.divf %90, %91 : vector<8x128xf32>
    %93 = math.tanh %87 : vector<8x128xf32>
    %94 = vector.extract_strided_slice %92 {offsets = [0, 0], sizes = [8, 32], strides = [1, 1]} : vector<8x128xf32> to vector<8x32xf32>
    %95 = vector.extract_strided_slice %92 {offsets = [0, 32], sizes = [8, 32], strides = [1, 1]} : vector<8x128xf32> to vector<8x32xf32>
    %96 = vector.extract_strided_slice %93 {offsets = [0, 64], sizes = [8, 32], strides = [1, 1]} : vector<8x128xf32> to vector<8x32xf32>
    %97 = vector.extract_strided_slice %92 {offsets = [0, 96], sizes = [8, 32], strides = [1, 1]} : vector<8x128xf32> to vector<8x32xf32>
    %98 = arith.mulf %95, %76 : vector<8x32xf32>
    %99 = arith.mulf %94, %96 : vector<8x32xf32>
    %100 = arith.addf %98, %99 : vector<8x32xf32>
    %101 = math.tanh %100 : vector<8x32xf32>
    %102 = arith.mulf %97, %101 : vector<8x32xf32>
    %c4 = arith.constant 4 : index
    %c0_27 = arith.constant 0 : index
    %c0_28 = arith.constant 0 : index
    %103 = vector.load %arg0[%c4, %c0_27, %c0_28] : memref<8x8x1xf32, #tpu.memory_space<vmem>>, vector<1x8x1xf32>
    %104 = vector.shape_cast %103 : vector<1x8x1xf32> to vector<8x1xf32>
    %105 = vector.broadcast %104 : vector<8x1xf32> to vector<8x128xf32>
    %106 = vector.broadcast %0 : vector<1x128xf32> to vector<8x128xf32>
    %107 = arith.mulf %105, %106 : vector<8x128xf32>
    %cst_29 = arith.constant dense<0.000000e+00> : vector<8x128xf32>
    %108 = tpu.matmul %102, %1, %cst_29 {dimension_numbers = #tpu.dot_dimension_numbers<[1], [0], [0], [1], [0, 0, 1, 1], [], []>} : vector<8x32xf32>, vector<32x128xf32>, vector<8x128xf32> -> vector<8x128xf32>
    %109 = arith.addf %107, %108 : vector<8x128xf32>
    %110 = vector.broadcast %2 : vector<1x128xf32> to vector<8x128xf32>
    %111 = arith.addf %109, %110 : vector<8x128xf32>
    %112 = arith.negf %111 : vector<8x128xf32>
    %113 = math.exp %112 : vector<8x128xf32>
    %cst_30 = arith.constant 1.000000e+00 : f32
    %114 = vector.broadcast %cst_30 : f32 to vector<8x128xf32>
    %115 = arith.addf %114, %113 : vector<8x128xf32>
    %116 = arith.divf %114, %115 : vector<8x128xf32>
    %117 = math.tanh %111 : vector<8x128xf32>
    %118 = vector.extract_strided_slice %116 {offsets = [0, 0], sizes = [8, 32], strides = [1, 1]} : vector<8x128xf32> to vector<8x32xf32>
    %119 = vector.extract_strided_slice %116 {offsets = [0, 32], sizes = [8, 32], strides = [1, 1]} : vector<8x128xf32> to vector<8x32xf32>
    %120 = vector.extract_strided_slice %117 {offsets = [0, 64], sizes = [8, 32], strides = [1, 1]} : vector<8x128xf32> to vector<8x32xf32>
    %121 = vector.extract_strided_slice %116 {offsets = [0, 96], sizes = [8, 32], strides = [1, 1]} : vector<8x128xf32> to vector<8x32xf32>
    %122 = arith.mulf %119, %100 : vector<8x32xf32>
    %123 = arith.mulf %118, %120 : vector<8x32xf32>
    %124 = arith.addf %122, %123 : vector<8x32xf32>
    %125 = math.tanh %124 : vector<8x32xf32>
    %126 = arith.mulf %121, %125 : vector<8x32xf32>
    %c5 = arith.constant 5 : index
    %c0_31 = arith.constant 0 : index
    %c0_32 = arith.constant 0 : index
    %127 = vector.load %arg0[%c5, %c0_31, %c0_32] : memref<8x8x1xf32, #tpu.memory_space<vmem>>, vector<1x8x1xf32>
    %128 = vector.shape_cast %127 : vector<1x8x1xf32> to vector<8x1xf32>
    %129 = vector.broadcast %128 : vector<8x1xf32> to vector<8x128xf32>
    %130 = vector.broadcast %0 : vector<1x128xf32> to vector<8x128xf32>
    %131 = arith.mulf %129, %130 : vector<8x128xf32>
    %cst_33 = arith.constant dense<0.000000e+00> : vector<8x128xf32>
    %132 = tpu.matmul %126, %1, %cst_33 {dimension_numbers = #tpu.dot_dimension_numbers<[1], [0], [0], [1], [0, 0, 1, 1], [], []>} : vector<8x32xf32>, vector<32x128xf32>, vector<8x128xf32> -> vector<8x128xf32>
    %133 = arith.addf %131, %132 : vector<8x128xf32>
    %134 = vector.broadcast %2 : vector<1x128xf32> to vector<8x128xf32>
    %135 = arith.addf %133, %134 : vector<8x128xf32>
    %136 = arith.negf %135 : vector<8x128xf32>
    %137 = math.exp %136 : vector<8x128xf32>
    %cst_34 = arith.constant 1.000000e+00 : f32
    %138 = vector.broadcast %cst_34 : f32 to vector<8x128xf32>
    %139 = arith.addf %138, %137 : vector<8x128xf32>
    %140 = arith.divf %138, %139 : vector<8x128xf32>
    %141 = math.tanh %135 : vector<8x128xf32>
    %142 = vector.extract_strided_slice %140 {offsets = [0, 0], sizes = [8, 32], strides = [1, 1]} : vector<8x128xf32> to vector<8x32xf32>
    %143 = vector.extract_strided_slice %140 {offsets = [0, 32], sizes = [8, 32], strides = [1, 1]} : vector<8x128xf32> to vector<8x32xf32>
    %144 = vector.extract_strided_slice %141 {offsets = [0, 64], sizes = [8, 32], strides = [1, 1]} : vector<8x128xf32> to vector<8x32xf32>
    %145 = vector.extract_strided_slice %140 {offsets = [0, 96], sizes = [8, 32], strides = [1, 1]} : vector<8x128xf32> to vector<8x32xf32>
    %146 = arith.mulf %143, %124 : vector<8x32xf32>
    %147 = arith.mulf %142, %144 : vector<8x32xf32>
    %148 = arith.addf %146, %147 : vector<8x32xf32>
    %149 = math.tanh %148 : vector<8x32xf32>
    %150 = arith.mulf %145, %149 : vector<8x32xf32>
    %c6 = arith.constant 6 : index
    %c0_35 = arith.constant 0 : index
    %c0_36 = arith.constant 0 : index
    %151 = vector.load %arg0[%c6, %c0_35, %c0_36] : memref<8x8x1xf32, #tpu.memory_space<vmem>>, vector<1x8x1xf32>
    %152 = vector.shape_cast %151 : vector<1x8x1xf32> to vector<8x1xf32>
    %153 = vector.broadcast %152 : vector<8x1xf32> to vector<8x128xf32>
    %154 = vector.broadcast %0 : vector<1x128xf32> to vector<8x128xf32>
    %155 = arith.mulf %153, %154 : vector<8x128xf32>
    %cst_37 = arith.constant dense<0.000000e+00> : vector<8x128xf32>
    %156 = tpu.matmul %150, %1, %cst_37 {dimension_numbers = #tpu.dot_dimension_numbers<[1], [0], [0], [1], [0, 0, 1, 1], [], []>} : vector<8x32xf32>, vector<32x128xf32>, vector<8x128xf32> -> vector<8x128xf32>
    %157 = arith.addf %155, %156 : vector<8x128xf32>
    %158 = vector.broadcast %2 : vector<1x128xf32> to vector<8x128xf32>
    %159 = arith.addf %157, %158 : vector<8x128xf32>
    %160 = arith.negf %159 : vector<8x128xf32>
    %161 = math.exp %160 : vector<8x128xf32>
    %cst_38 = arith.constant 1.000000e+00 : f32
    %162 = vector.broadcast %cst_38 : f32 to vector<8x128xf32>
    %163 = arith.addf %162, %161 : vector<8x128xf32>
    %164 = arith.divf %162, %163 : vector<8x128xf32>
    %165 = math.tanh %159 : vector<8x128xf32>
    %166 = vector.extract_strided_slice %164 {offsets = [0, 0], sizes = [8, 32], strides = [1, 1]} : vector<8x128xf32> to vector<8x32xf32>
    %167 = vector.extract_strided_slice %164 {offsets = [0, 32], sizes = [8, 32], strides = [1, 1]} : vector<8x128xf32> to vector<8x32xf32>
    %168 = vector.extract_strided_slice %165 {offsets = [0, 64], sizes = [8, 32], strides = [1, 1]} : vector<8x128xf32> to vector<8x32xf32>
    %169 = vector.extract_strided_slice %164 {offsets = [0, 96], sizes = [8, 32], strides = [1, 1]} : vector<8x128xf32> to vector<8x32xf32>
    %170 = arith.mulf %167, %148 : vector<8x32xf32>
    %171 = arith.mulf %166, %168 : vector<8x32xf32>
    %172 = arith.addf %170, %171 : vector<8x32xf32>
    %173 = math.tanh %172 : vector<8x32xf32>
    %174 = arith.mulf %169, %173 : vector<8x32xf32>
    %c7 = arith.constant 7 : index
    %c0_39 = arith.constant 0 : index
    %c0_40 = arith.constant 0 : index
    %175 = vector.load %arg0[%c7, %c0_39, %c0_40] : memref<8x8x1xf32, #tpu.memory_space<vmem>>, vector<1x8x1xf32>
    %176 = vector.shape_cast %175 : vector<1x8x1xf32> to vector<8x1xf32>
    %177 = vector.broadcast %176 : vector<8x1xf32> to vector<8x128xf32>
    %178 = vector.broadcast %0 : vector<1x128xf32> to vector<8x128xf32>
    %179 = arith.mulf %177, %178 : vector<8x128xf32>
    %cst_41 = arith.constant dense<0.000000e+00> : vector<8x128xf32>
    %180 = tpu.matmul %174, %1, %cst_41 {dimension_numbers = #tpu.dot_dimension_numbers<[1], [0], [0], [1], [0, 0, 1, 1], [], []>} : vector<8x32xf32>, vector<32x128xf32>, vector<8x128xf32> -> vector<8x128xf32>
    %181 = arith.addf %179, %180 : vector<8x128xf32>
    %182 = vector.broadcast %2 : vector<1x128xf32> to vector<8x128xf32>
    %183 = arith.addf %181, %182 : vector<8x128xf32>
    %184 = arith.negf %183 : vector<8x128xf32>
    %185 = math.exp %184 : vector<8x128xf32>
    %cst_42 = arith.constant 1.000000e+00 : f32
    %186 = vector.broadcast %cst_42 : f32 to vector<8x128xf32>
    %187 = arith.addf %186, %185 : vector<8x128xf32>
    %188 = arith.divf %186, %187 : vector<8x128xf32>
    %189 = math.tanh %183 : vector<8x128xf32>
    %190 = vector.extract_strided_slice %188 {offsets = [0, 0], sizes = [8, 32], strides = [1, 1]} : vector<8x128xf32> to vector<8x32xf32>
    %191 = vector.extract_strided_slice %188 {offsets = [0, 32], sizes = [8, 32], strides = [1, 1]} : vector<8x128xf32> to vector<8x32xf32>
    %192 = vector.extract_strided_slice %189 {offsets = [0, 64], sizes = [8, 32], strides = [1, 1]} : vector<8x128xf32> to vector<8x32xf32>
    %193 = vector.extract_strided_slice %188 {offsets = [0, 96], sizes = [8, 32], strides = [1, 1]} : vector<8x128xf32> to vector<8x32xf32>
    %194 = arith.mulf %191, %172 : vector<8x32xf32>
    %195 = arith.mulf %190, %192 : vector<8x32xf32>
    %196 = arith.addf %194, %195 : vector<8x32xf32>
    %197 = math.tanh %196 : vector<8x32xf32>
    %198 = arith.mulf %193, %197 : vector<8x32xf32>
    %cst_43 = arith.constant dense<0.000000e+00> : vector<8x128xf32>
    %199 = tpu.matmul %198, %1, %cst_43 {dimension_numbers = #tpu.dot_dimension_numbers<[1], [0], [0], [1], [0, 0, 1, 1], [], []>} : vector<8x32xf32>, vector<32x128xf32>, vector<8x128xf32> -> vector<8x128xf32>
    %200 = vector.broadcast %2 : vector<1x128xf32> to vector<8x128xf32>
    %201 = arith.addf %199, %200 : vector<8x128xf32>
    %202 = vector.broadcast %3 : vector<1x32xf32> to vector<8x32xf32>
    %203 = arith.mulf %198, %202 : vector<8x32xf32>
    %cst_44 = arith.constant dense<0.000000e+00> : vector<8xf32>
    %204 = vector.multi_reduction <add>, %203, %cst_44 [1] : vector<8x32xf32> to vector<8xf32>
    %205 = vector.shape_cast %204 : vector<8xf32> to vector<8x1xf32>
    %206 = vector.broadcast %4 : vector<1x1xf32> to vector<8x1xf32>
    %207 = arith.addf %205, %206 : vector<8x1xf32>
    %208 = vector.broadcast %207 : vector<8x1xf32> to vector<8x128xf32>
    %209 = vector.broadcast %0 : vector<1x128xf32> to vector<8x128xf32>
    %210 = arith.mulf %208, %209 : vector<8x128xf32>
    %211 = arith.addf %210, %201 : vector<8x128xf32>
    %212 = arith.negf %211 : vector<8x128xf32>
    %213 = math.exp %212 : vector<8x128xf32>
    %cst_45 = arith.constant 1.000000e+00 : f32
    %214 = vector.broadcast %cst_45 : f32 to vector<8x128xf32>
    %215 = arith.addf %214, %213 : vector<8x128xf32>
    %216 = arith.divf %214, %215 : vector<8x128xf32>
    %217 = math.tanh %211 : vector<8x128xf32>
    %218 = vector.extract_strided_slice %216 {offsets = [0, 0], sizes = [8, 32], strides = [1, 1]} : vector<8x128xf32> to vector<8x32xf32>
    %219 = vector.extract_strided_slice %216 {offsets = [0, 32], sizes = [8, 32], strides = [1, 1]} : vector<8x128xf32> to vector<8x32xf32>
    %220 = vector.extract_strided_slice %217 {offsets = [0, 64], sizes = [8, 32], strides = [1, 1]} : vector<8x128xf32> to vector<8x32xf32>
    %221 = vector.extract_strided_slice %216 {offsets = [0, 96], sizes = [8, 32], strides = [1, 1]} : vector<8x128xf32> to vector<8x32xf32>
    %222 = arith.mulf %219, %196 : vector<8x32xf32>
    %223 = arith.mulf %218, %220 : vector<8x32xf32>
    %224 = arith.addf %222, %223 : vector<8x32xf32>
    %225 = math.tanh %224 : vector<8x32xf32>
    %226 = arith.mulf %221, %225 : vector<8x32xf32>
    %227 = vector.broadcast %3 : vector<1x32xf32> to vector<8x32xf32>
    %228 = arith.mulf %226, %227 : vector<8x32xf32>
    %cst_46 = arith.constant dense<0.000000e+00> : vector<8xf32>
    %229 = vector.multi_reduction <add>, %228, %cst_46 [1] : vector<8x32xf32> to vector<8xf32>
    %230 = vector.shape_cast %229 : vector<8xf32> to vector<8x1xf32>
    %231 = vector.broadcast %4 : vector<1x1xf32> to vector<8x1xf32>
    %232 = arith.addf %230, %231 : vector<8x1xf32>
    %233 = vector.broadcast %232 : vector<8x1xf32> to vector<8x128xf32>
    %234 = vector.broadcast %0 : vector<1x128xf32> to vector<8x128xf32>
    %235 = arith.mulf %233, %234 : vector<8x128xf32>
    %236 = arith.addf %235, %201 : vector<8x128xf32>
    %237 = arith.negf %236 : vector<8x128xf32>
    %238 = math.exp %237 : vector<8x128xf32>
    %cst_47 = arith.constant 1.000000e+00 : f32
    %239 = vector.broadcast %cst_47 : f32 to vector<8x128xf32>
    %240 = arith.addf %239, %238 : vector<8x128xf32>
    %241 = arith.divf %239, %240 : vector<8x128xf32>
    %242 = math.tanh %236 : vector<8x128xf32>
    %243 = vector.extract_strided_slice %241 {offsets = [0, 0], sizes = [8, 32], strides = [1, 1]} : vector<8x128xf32> to vector<8x32xf32>
    %244 = vector.extract_strided_slice %241 {offsets = [0, 32], sizes = [8, 32], strides = [1, 1]} : vector<8x128xf32> to vector<8x32xf32>
    %245 = vector.extract_strided_slice %242 {offsets = [0, 64], sizes = [8, 32], strides = [1, 1]} : vector<8x128xf32> to vector<8x32xf32>
    %246 = vector.extract_strided_slice %241 {offsets = [0, 96], sizes = [8, 32], strides = [1, 1]} : vector<8x128xf32> to vector<8x32xf32>
    %247 = arith.mulf %244, %196 : vector<8x32xf32>
    %248 = arith.mulf %243, %245 : vector<8x32xf32>
    %249 = arith.addf %247, %248 : vector<8x32xf32>
    %250 = math.tanh %249 : vector<8x32xf32>
    %251 = arith.mulf %246, %250 : vector<8x32xf32>
    %252 = vector.broadcast %3 : vector<1x32xf32> to vector<8x32xf32>
    %253 = arith.mulf %251, %252 : vector<8x32xf32>
    %cst_48 = arith.constant dense<0.000000e+00> : vector<8xf32>
    %254 = vector.multi_reduction <add>, %253, %cst_48 [1] : vector<8x32xf32> to vector<8xf32>
    %255 = vector.shape_cast %254 : vector<8xf32> to vector<8x1xf32>
    %256 = vector.broadcast %4 : vector<1x1xf32> to vector<8x1xf32>
    %257 = arith.addf %255, %256 : vector<8x1xf32>
    %258 = vector.broadcast %257 : vector<8x1xf32> to vector<8x128xf32>
    %259 = vector.broadcast %0 : vector<1x128xf32> to vector<8x128xf32>
    %260 = arith.mulf %258, %259 : vector<8x128xf32>
    %261 = arith.addf %260, %201 : vector<8x128xf32>
    %262 = arith.negf %261 : vector<8x128xf32>
    %263 = math.exp %262 : vector<8x128xf32>
    %cst_49 = arith.constant 1.000000e+00 : f32
    %264 = vector.broadcast %cst_49 : f32 to vector<8x128xf32>
    %265 = arith.addf %264, %263 : vector<8x128xf32>
    %266 = arith.divf %264, %265 : vector<8x128xf32>
    %267 = math.tanh %261 : vector<8x128xf32>
    %268 = vector.extract_strided_slice %266 {offsets = [0, 0], sizes = [8, 32], strides = [1, 1]} : vector<8x128xf32> to vector<8x32xf32>
    %269 = vector.extract_strided_slice %266 {offsets = [0, 32], sizes = [8, 32], strides = [1, 1]} : vector<8x128xf32> to vector<8x32xf32>
    %270 = vector.extract_strided_slice %267 {offsets = [0, 64], sizes = [8, 32], strides = [1, 1]} : vector<8x128xf32> to vector<8x32xf32>
    %271 = vector.extract_strided_slice %266 {offsets = [0, 96], sizes = [8, 32], strides = [1, 1]} : vector<8x128xf32> to vector<8x32xf32>
    %272 = arith.mulf %269, %196 : vector<8x32xf32>
    %273 = arith.mulf %268, %270 : vector<8x32xf32>
    %274 = arith.addf %272, %273 : vector<8x32xf32>
    %275 = math.tanh %274 : vector<8x32xf32>
    %276 = arith.mulf %271, %275 : vector<8x32xf32>
    %277 = vector.broadcast %3 : vector<1x32xf32> to vector<8x32xf32>
    %278 = arith.mulf %276, %277 : vector<8x32xf32>
    %cst_50 = arith.constant dense<0.000000e+00> : vector<8xf32>
    %279 = vector.multi_reduction <add>, %278, %cst_50 [1] : vector<8x32xf32> to vector<8xf32>
    %280 = vector.shape_cast %279 : vector<8xf32> to vector<8x1xf32>
    %281 = vector.broadcast %4 : vector<1x1xf32> to vector<8x1xf32>
    %282 = arith.addf %280, %281 : vector<8x1xf32>
    %283 = tpu.concatenate %207, %232, %257, %282 in 1 : vector<8x1xf32>, vector<8x1xf32>, vector<8x1xf32>, vector<8x1xf32> -> vector<8x4xf32>
    %c0_51 = arith.constant 0 : index
    %c0_52 = arith.constant 0 : index
    %284 = vector.load %arg8[%c0_51, %c0_52] : memref<8x4xf32, #tpu.memory_space<vmem>>, vector<8x4xf32>
    tpu.vector_store %arg8[%c0_51, %c0_52], %283 {strides = array<i32>} : memref<8x4xf32, #tpu.memory_space<vmem>>, vector<8x4xf32>,
    return
  }
}

</mosaic_0001>

<bundles_post_ra>
// kernel: tpu_custom_call.1
= control target key start
LH: loop header
LB: loop body
LE: loop exit
PB: predicated region body
PF: predicated region fallthrough
CT: control target
= control target key end

     0   :  { %s1227_s0 = inlined_call_operand.vmem [shape: f32[8,8,1], index: 0, kind: input, shape index: {}]   ;;  %s1228_s1 = inlined_call_operand.vmem [shape: f32[1,128], index: 1, kind: input, shape index: {}]   ;;  %s1229_s2 = inlined_call_operand.hbm [shape: f32[32,128], index: 2, kind: input, shape index: {}]   ;;  %s1230_s3 = inlined_call_operand.vmem [shape: f32[1,128], index: 3, kind: input, shape index: {}]   ;;  %s1231_s4 = inlined_call_operand.vmem [shape: f32[64,128], index: 4, kind: input, shape index: {}]   ;;  %s1232_s5 = inlined_call_operand.vmem [shape: f32[1,128], index: 5, kind: input, shape index: {}]   ;;  %s1233_s6 = inlined_call_operand.vmem [shape: f32[1,32], index: 6, kind: input, shape index: {}]   ;;  %s1234_s7 = inlined_call_operand.<no memory space> [shape: f32[1,1], index: 7, kind: input, shape index: {}]   ;;  %s1235_s8 = inlined_call_operand.vmem [shape: f32[8,4], index: 8, kind: output, shape index: {}]  }
   0x1   :  { %v13_v0 = vstv %s1234_s7 }
   0x2   :  { %14 = vst [vmem:[#allocation2] sm:$0x1] %v13_v0 }
   0x3   :  { %15 = vsyncpa [#allocation4], 0  ;;  %s24_s30 = sshll.u32 %s1229_s2, 4  ;;  %s1017_s5 = smov [#allocation3]   ;;  %s25_s30 = int_to_ptr.hbm [resolvable:$true] %s24_s30 }
   0x4   :  { %s26_s9 = sshll.u32 %s1017_s5, 4  ;;  %s1018_s10 = smov 128   ;;  %s27_s9 = int_to_ptr.vmem [resolvable:$true] %s26_s9 }
   0x5   :  { %s1019_s11 = smov 8  }
   0x6   :  { %32 = dma.hbm_to_vmem [thread:$0]  %s25_s30, 512, %s27_s9, [#allocation4], %s1018_s10, %s1018_s10, %s1019_s11  }
   0x7   :  { %1015 = dma.done.wait [#allocation4], 512  }
   0x8   :  { %1016 = vsyncadd [#allocation4], 4294966784  ;;  %v1020_v1 = vmov 0   ;;  %v51_v2 = vld [vmem:[#allocation3 + $0x18] sm:$0xff]  ;;  %v50_v3 = vld [vmem:[#allocation3 + $0x10] sm:$0xff]  ;;  %v1021_v7 = vmov 0.0  }
   0x9   :  { %896 = vset.pattern.permute.xlu0 %v1020_v1  ;;  %897 = vset.pattern.permute.xlu2 %v1020_v1  ;;  %v49_v4 = vld [vmem:[#allocation3 + $0x8] sm:$0xff]  ;;  %v55_v5 = vld [vmem:[%s1227_s0] sm:$0xff]  ;;  %s1022_s16 = smov 64   ;;  %vm65_vm4 = vcmask 261120   ;;  %s1024_s30 = smov 96  }
   0xa   :  { %898 = vset.pattern.permute.xlu1 %v1020_v1  ;;  %81 = vmatpush.msra.mxu0 %v51_v2  ;;  %v48_v6 = vld [vmem:[#allocation3] sm:$0xff]  ;;  %v1085_v8 = vld [vmem:[%s1228_s1] ss:$0 sm:$0xff]  ;;  %s1023_s1 = smov 32   ;;  %s1026_s5 = smov 2  }
   0xb   :  { %156 = vmatpush.msra.mxu1 %v51_v2  ;;  %58 = vperm.xlu0 %896, %v55_v5   ;;  %v1091_v11 = vld [vmem:[%s1230_s3] ss:$0 sm:$0xff]  ;;  %v860_v37 = vld [vmem:[%s1227_s0 + $0x8] sm:$0xff]  ;;  %s1027_s9 = smov 3  }
   0xc   :  { %228 = vmatpush.msra.mxu2 %v51_v2  ;;  %82 = vmatpush.msra.mxu0 %v50_v3 }
   0xd   :  { %157 = vmatpush.msra.mxu1 %v50_v3  ;;  %300 = vmatpush.msra.mxu3 %v51_v2 }
   0xe   :  { %229 = vmatpush.msra.mxu2 %v50_v3  ;;  %83 = vmatpush.msra.mxu0 %v49_v4 }
   0xf   :  { %158 = vmatpush.msra.mxu1 %v49_v4  ;;  %301 = vmatpush.msra.mxu3 %v50_v3 }
  0x10   :  { %230 = vmatpush.msra.mxu2 %v49_v4  ;;  %84 = vmatpush.msra.mxu0 %v48_v6 }
  0x11   :  { %159 = vmatpush.msra.mxu1 %v48_v6  ;;  %85 = vmatmul.f32.vlgmr.msra.gmra.mxu0 %v1021_v7 }
  0x12   :  { %231 = vmatpush.msra.mxu2 %v48_v6  ;;  %302 = vmatpush.msra.mxu3 %v49_v4 }
  0x13   :  { %372 = vmatpush.msrb.mxu0 %v51_v2  ;;  %444 = vmatpush.msrb.mxu1 %v51_v2 }
  0x14   :  { %516 = vmatpush.msrb.mxu2 %v51_v2  ;;  %303 = vmatpush.msra.mxu3 %v48_v6 }
  0x15   :  { %373 = vmatpush.msrb.mxu0 %v50_v3  ;;  %445 = vmatpush.msrb.mxu1 %v50_v3 }
  0x16   :  { %517 = vmatpush.msrb.mxu2 %v50_v3  ;;  %588 = vmatpush.msrb.mxu3 %v51_v2 }
  0x17   :  { %374 = vmatpush.msrb.mxu0 %v49_v4  ;;  %446 = vmatpush.msrb.mxu1 %v49_v4 }
  0x18   :  { %518 = vmatpush.msrb.mxu2 %v49_v4  ;;  %589 = vmatpush.msrb.mxu3 %v50_v3 }
  0x19   :  { %375 = vmatpush.msrb.mxu0 %v48_v6  ;;  %447 = vmatpush.msrb.mxu1 %v48_v6 }
  0x1a   :  { %519 = vmatpush.msrb.mxu2 %v48_v6  ;;  %590 = vmatpush.msrb.mxu3 %v49_v4 }
  0x1b   :  { %652 = vmatpush.msra.mxu0 %v51_v2  ;;  %v863_v2 = vld [vmem:[%s1227_s0 + $0x10] sm:$0xff] }
  0x1c   :  { %591 = vmatpush.msrb.mxu3 %v48_v6 }
  0x1d   :  { %653 = vmatpush.msra.mxu0 %v50_v3 }
  0x1f   :  { %654 = vmatpush.msra.mxu0 %v49_v4 }
  0x21   :  { %655 = vmatpush.msra.mxu0 %v48_v6 }
  0x7d   :  { %v59_v9 = vpop.permute.xlu0 %58 }
  0x7e   :  { %v64_v10 = vmul.f32 %v1085_v8, %v59_v9 }
  0x8e   :  { %v86_v12 = vpop.f32.mrf.mxu0 }
  0x8f   :  { %v89_v13 = vadd.f32 %v86_v12, %v64_v10 }
  0x91   :  { %v93_v14 = vadd.f32 %v1091_v11, %v89_v13 }
  0x93   :  { %903 = vtanh.f32 %v93_v14  ;;  %v859_v16 = vmul.f32 -1.442695, %v93_v14 }
  0x95   :  { %905 = vpow2.f32 %v859_v16 }
  0x99   :  { %v904_v15 = vpop.eup %903 }
  0x9a   :  { %116 = vrot.lane.b32.xlu0 %v904_v15, %s1022_s16 }
  0x9b   :  { %v906_v17 = vpop.eup %905 }
  0x9c   :  { %v97_v18 = vadd.f32 1.0, %v906_v17 }
  0x9e   :  { %907 = vrcp.f32 %v97_v18  ;;  %v109_v24 = vand.u32 2147483648, %v97_v18  ;;  %vm103_vm1 = vweird.f32 %v97_v18  ;;  %v107_v25 = vand.u32 2147483647, %v97_v18 }
  0xa0   :  { %v110_v27 = vor.u32 1.1754944e-38, %v109_v24  ;;  %vm108_vm3 = vcmp.eq.f32.partialorder %v107_v25, 8.507059e+37 }
  0xa4   :  { %v908_v19 = vpop.eup %907 }
  0xa5   :  { %v99_v20 = vmul.f32 %v908_v19, %v97_v18  ;;  %vm104_vm0 = vweird.f32 %v908_v19 }
  0xa6   :  { %vm105_vm2 = vmor %vm103_vm1, %vm104_vm0 }
  0xa7   :  { %v100_v21 = vsub.f32 1.0, %v99_v20 }
  0xa9   :  { %v101_v22 = vmul.f32 %v908_v19, %v100_v21 }
  0xab   :  { %v102_v23 = vadd.f32 %v908_v19, %v101_v22 }
  0xad   :  { %v106_v26 = vsel %vm105_vm2, %v908_v19, %v102_v23 }
  0xae   :  { %v111_v29 = vsel %vm108_vm3, %v110_v27, %v106_v26  ;;  %v866_v27 = vld [vmem:[%s1227_s0 + $0x18] sm:$0xff] }
  0xaf   :  { %v114_v31 = vmul.f32 0.0, %v111_v29 }
 0x10c   :  { %v117_v28 = vpop.permute.xlu0 %116 }
 0x10d   :  { %v119_v30 = vmul.f32 %v117_v28, %v111_v29 }
 0x10f   :  { %121 = vrot.lane.b32.xlu1 %v119_v30, %s1023_s1 }
 0x181   :  { %v122_v32 = vpop.permute.xlu1 %121 }
 0x182   :  { %v124_v33 = vadd.f32 %v122_v32, %v114_v31 }
 0x184   :  { %909 = vtanh.f32 %v124_v33 }
 0x18a   :  { %v910_v34 = vpop.eup %909 }
 0x18b   :  { %127 = vrot.lane.b32.xlu1 %v910_v34, %s1022_s16 }
 0x1fd   :  { %v128_v35 = vpop.permute.xlu1 %127 }
 0x1fe   :  { %v130_v36 = vmul.f32 %v128_v35, %v111_v29 }
 0x200   :  { %140 = vrot.lane.b32.xlu2 %v130_v36, %s1023_s1 }
 0x208   :  { %135 = vperm.xlu2 %897, %v860_v37  }
 0x25a   :  { %v141_v38 = vpop.permute.xlu2 %140 }
 0x25b   :  { %861 = vmatmul.msk.f32.vlgmr.msra.gmra.mxu1 %vm65_vm4, %v141_v38 }
 0x262   :  { %v136_v39 = vpop.permute.xlu2 %135 }
 0x263   :  { %v138_v40 = vmul.f32 %v1085_v8, %v136_v39 }
 0x2d8   :  { %v161_v41 = vpop.f32.mrf.mxu1 }
 0x2d9   :  { %v164_v42 = vadd.f32 %v161_v41, %v138_v40 }
 0x2db   :  { %v165_v43 = vadd.f32 %v1091_v11, %v164_v42 }
 0x2dd   :  { %911 = vtanh.f32 %v165_v43  ;;  %v862_v45 = vmul.f32 -1.442695, %v165_v43 }
 0x2df   :  { %913 = vpow2.f32 %v862_v45 }
 0x2e3   :  { %v912_v44 = vpop.eup %911 }
 0x2e4   :  { %188 = vrot.lane.b32.xlu0 %v912_v44, %s1022_s16 }
 0x2e5   :  { %v914_v46 = vpop.eup %913 }
 0x2e6   :  { %v169_v47 = vadd.f32 1.0, %v914_v46 }
 0x2e8   :  { %915 = vrcp.f32 %v169_v47  ;;  %v181_v53 = vand.u32 2147483648, %v169_v47  ;;  %vm175_vm6 = vweird.f32 %v169_v47  ;;  %v179_v54 = vand.u32 2147483647, %v169_v47 }
 0x2ea   :  { %v182_v56 = vor.u32 1.1754944e-38, %v181_v53  ;;  %vm180_vm8 = vcmp.eq.f32.partialorder %v179_v54, 8.507059e+37 }
 0x2ee   :  { %v916_v48 = vpop.eup %915 }
 0x2ef   :  { %v171_v49 = vmul.f32 %v916_v48, %v169_v47  ;;  %vm176_vm5 = vweird.f32 %v916_v48 }
 0x2f0   :  { %vm177_vm7 = vmor %vm175_vm6, %vm176_vm5 }
 0x2f1   :  { %v172_v50 = vsub.f32 1.0, %v171_v49 }
 0x2f3   :  { %v173_v51 = vmul.f32 %v916_v48, %v172_v50 }
 0x2f5   :  { %v174_v52 = vadd.f32 %v916_v48, %v173_v51 }
 0x2f7   :  { %v178_v55 = vsel %vm177_vm7, %v916_v48, %v174_v52 }
 0x2f8   :  { %v183_v58 = vsel %vm180_vm8, %v182_v56, %v178_v55  ;;  %v869_v56 = vld [vmem:[%s1227_s0 + $0x20] sm:$0xff] }
 0x2f9   :  { %v186_v60 = vmul.f32 %v183_v58, %v124_v33 }
 0x356   :  { %v189_v57 = vpop.permute.xlu0 %188 }
 0x357   :  { %v191_v59 = vmul.f32 %v189_v57, %v183_v58 }
 0x359   :  { %193 = vrot.lane.b32.xlu1 %v191_v59, %s1023_s1 }
 0x361   :  { %207 = vperm.xlu1 %898, %v863_v2  }
 0x3cb   :  { %v194_v61 = vpop.permute.xlu1 %193 }
 0x3cc   :  { %v196_v62 = vadd.f32 %v194_v61, %v186_v60 }
 0x3ce   :  { %917 = vtanh.f32 %v196_v62 }
 0x3d3   :  { %v208_v4 = vpop.permute.xlu1 %207 }
 0x3d4   :  { %v918_v63 = vpop.eup %917  ;;  %v210_v5 = vmul.f32 %v1085_v8, %v208_v4 }
 0x3d5   :  { %199 = vrot.lane.b32.xlu2 %v918_v63, %s1022_s16 }
 0x42f   :  { %v200_v0 = vpop.permute.xlu2 %199 }
 0x430   :  { %v202_v1 = vmul.f32 %v200_v0, %v183_v58 }
 0x432   :  { %212 = vrot.lane.b32.xlu0 %v202_v1, %s1023_s1 }
 0x4a4   :  { %v213_v3 = vpop.permute.xlu0 %212 }
 0x4a5   :  { %864 = vmatmul.msk.f32.vlgmr.msra.gmra.mxu2 %vm65_vm4, %v213_v3 }
 0x528   :  { %v233_v6 = vpop.f32.mrf.mxu2 }
 0x529   :  { %v236_v7 = vadd.f32 %v233_v6, %v210_v5 }
 0x52b   :  { %v237_v9 = vadd.f32 %v1091_v11, %v236_v7 }
 0x52d   :  { %919 = vtanh.f32 %v237_v9  ;;  %v865_v12 = vmul.f32 -1.442695, %v237_v9 }
 0x52f   :  { %921 = vpow2.f32 %v865_v12 }
 0x533   :  { %v920_v10 = vpop.eup %919 }
 0x534   :  { %260 = vrot.lane.b32.xlu2 %v920_v10, %s1022_s16 }
 0x535   :  { %v922_v13 = vpop.eup %921 }
 0x536   :  { %v241_v14 = vadd.f32 1.0, %v922_v13 }
 0x538   :  { %923 = vrcp.f32 %v241_v14  ;;  %v253_v20 = vand.u32 2147483648, %v241_v14  ;;  %vm247_vm10 = vweird.f32 %v241_v14  ;;  %v251_v21 = vand.u32 2147483647, %v241_v14 }
 0x53a   :  { %v254_v23 = vor.u32 1.1754944e-38, %v253_v20  ;;  %vm252_vm12 = vcmp.eq.f32.partialorder %v251_v21, 8.507059e+37 }
 0x53e   :  { %v924_v15 = vpop.eup %923 }
 0x53f   :  { %v243_v16 = vmul.f32 %v924_v15, %v241_v14  ;;  %vm248_vm9 = vweird.f32 %v924_v15 }
 0x540   :  { %vm249_vm11 = vmor %vm247_vm10, %vm248_vm9 }
 0x541   :  { %v244_v17 = vsub.f32 1.0, %v243_v16 }
 0x543   :  { %v245_v18 = vmul.f32 %v924_v15, %v244_v17 }
 0x545   :  { %v246_v19 = vadd.f32 %v924_v15, %v245_v18 }
 0x547   :  { %v250_v22 = vsel %vm249_vm11, %v924_v15, %v246_v19 }
 0x548   :  { %v255_v25 = vsel %vm252_vm12, %v254_v23, %v250_v22  ;;  %v872_v23 = vld [vmem:[%s1227_s0 + $0x28] sm:$0xff] }
 0x549   :  { %v258_v28 = vmul.f32 %v255_v25, %v196_v62 }
 0x58e   :  { %v261_v24 = vpop.permute.xlu2 %260 }
 0x58f   :  { %v263_v26 = vmul.f32 %v261_v24, %v255_v25 }
 0x591   :  { %265 = vrot.lane.b32.xlu0 %v263_v26, %s1023_s1 }
 0x599   :  { %279 = vperm.xlu0 %896, %v866_v27  }
 0x603   :  { %v266_v29 = vpop.permute.xlu0 %265 }
 0x604   :  { %v268_v30 = vadd.f32 %v266_v29, %v258_v28 }
 0x606   :  { %925 = vtanh.f32 %v268_v30 }
 0x60b   :  { %v280_v35 = vpop.permute.xlu0 %279 }
 0x60c   :  { %v926_v31 = vpop.eup %925  ;;  %v282_v36 = vmul.f32 %v1085_v8, %v280_v35 }
 0x60d   :  { %271 = vrot.lane.b32.xlu1 %v926_v31, %s1022_s16 }
 0x67f   :  { %v272_v32 = vpop.permute.xlu1 %271 }
 0x680   :  { %v274_v33 = vmul.f32 %v272_v32, %v255_v25 }
 0x682   :  { %284 = vrot.lane.b32.xlu2 %v274_v33, %s1023_s1 }
 0x6dc   :  { %v285_v34 = vpop.permute.xlu2 %284 }
 0x6dd   :  { %867 = vmatmul.msk.f32.vlgmr.msra.gmra.mxu3 %vm65_vm4, %v285_v34 }
 0x760   :  { %v305_v37 = vpop.f32.mrf.mxu3 }
 0x761   :  { %v308_v38 = vadd.f32 %v305_v37, %v282_v36 }
 0x763   :  { %v309_v39 = vadd.f32 %v1091_v11, %v308_v38 }
 0x765   :  { %927 = vtanh.f32 %v309_v39  ;;  %v868_v41 = vmul.f32 -1.442695, %v309_v39 }
 0x767   :  { %929 = vpow2.f32 %v868_v41 }
 0x76b   :  { %v928_v40 = vpop.eup %927 }
 0x76c   :  { %332 = vrot.lane.b32.xlu1 %v928_v40, %s1022_s16 }
 0x76d   :  { %v930_v42 = vpop.eup %929 }
 0x76e   :  { %v313_v43 = vadd.f32 1.0, %v930_v42 }
 0x770   :  { %931 = vrcp.f32 %v313_v43  ;;  %v325_v49 = vand.u32 2147483648, %v313_v43  ;;  %vm319_vm14 = vweird.f32 %v313_v43  ;;  %v323_v50 = vand.u32 2147483647, %v313_v43 }
 0x772   :  { %v326_v52 = vor.u32 1.1754944e-38, %v325_v49  ;;  %vm324_vm0 = vcmp.eq.f32.partialorder %v323_v50, 8.507059e+37 }
 0x776   :  { %v932_v44 = vpop.eup %931 }
 0x777   :  { %v315_v45 = vmul.f32 %v932_v44, %v313_v43  ;;  %vm320_vm13 = vweird.f32 %v932_v44 }
 0x778   :  { %vm321_vm15 = vmor %vm319_vm14, %vm320_vm13 }
 0x779   :  { %v316_v46 = vsub.f32 1.0, %v315_v45 }
 0x77b   :  { %v317_v47 = vmul.f32 %v932_v44, %v316_v46 }
 0x77d   :  { %v318_v48 = vadd.f32 %v932_v44, %v317_v47 }
 0x77f   :  { %v322_v51 = vsel %vm321_vm15, %v932_v44, %v318_v48 }
 0x780   :  { %v327_v54 = vsel %vm324_vm0, %v326_v52, %v322_v51  ;;  %v875_v52 = vld [vmem:[%s1227_s0 + $0x30] sm:$0xff] }
 0x781   :  { %v330_v57 = vmul.f32 %v327_v54, %v268_v30 }
 0x7de   :  { %v333_v53 = vpop.permute.xlu1 %332 }
 0x7df   :  { %v335_v55 = vmul.f32 %v333_v53, %v327_v54 }
 0x7e1   :  { %337 = vrot.lane.b32.xlu2 %v335_v55, %s1023_s1 }
 0x7e9   :  { %351 = vperm.xlu2 %897, %v869_v56  }
 0x83b   :  { %v338_v58 = vpop.permute.xlu2 %337 }
 0x83c   :  { %v340_v59 = vadd.f32 %v338_v58, %v330_v57 }
 0x83e   :  { %933 = vtanh.f32 %v340_v59 }
 0x843   :  { %v352_v0 = vpop.permute.xlu2 %351 }
 0x844   :  { %v934_v60 = vpop.eup %933  ;;  %v354_v1 = vmul.f32 %v1085_v8, %v352_v0 }
 0x845   :  { %343 = vrot.lane.b32.xlu0 %v934_v60, %s1022_s16 }
 0x8b7   :  { %v344_v61 = vpop.permute.xlu0 %343 }
 0x8b8   :  { %v346_v62 = vmul.f32 %v344_v61, %v327_v54 }
 0x8ba   :  { %356 = vrot.lane.b32.xlu1 %v346_v62, %s1023_s1 }
 0x92c   :  { %v357_v63 = vpop.permute.xlu1 %356 }
 0x92d   :  { %870 = vmatmul.msk.f32.vlgmr.msrb.gmra.mxu0 %vm65_vm4, %v357_v63 }
 0x9aa   :  { %v377_v2 = vpop.f32.mrf.mxu0 }
 0x9ab   :  { %v380_v3 = vadd.f32 %v377_v2, %v354_v1 }
 0x9ad   :  { %v381_v4 = vadd.f32 %v1091_v11, %v380_v3 }
 0x9af   :  { %935 = vtanh.f32 %v381_v4  ;;  %v871_v6 = vmul.f32 -1.442695, %v381_v4 }
 0x9b1   :  { %937 = vpow2.f32 %v871_v6 }
 0x9b5   :  { %v936_v5 = vpop.eup %935 }
 0x9b6   :  { %404 = vrot.lane.b32.xlu0 %v936_v5, %s1022_s16 }
 0x9b7   :  { %v938_v7 = vpop.eup %937 }
 0x9b8   :  { %v385_v9 = vadd.f32 1.0, %v938_v7 }
 0x9ba   :  { %939 = vrcp.f32 %v385_v9  ;;  %v397_v16 = vand.u32 2147483648, %v385_v9  ;;  %vm391_vm2 = vweird.f32 %v385_v9  ;;  %v395_v17 = vand.u32 2147483647, %v385_v9 }
 0x9bc   :  { %v398_v19 = vor.u32 1.1754944e-38, %v397_v16  ;;  %vm396_vm5 = vcmp.eq.f32.partialorder %v395_v17, 8.507059e+37 }
 0x9c0   :  { %v940_v10 = vpop.eup %939 }
 0x9c1   :  { %v387_v12 = vmul.f32 %v940_v10, %v385_v9  ;;  %vm392_vm1 = vweird.f32 %v940_v10 }
 0x9c2   :  { %vm393_vm3 = vmor %vm391_vm2, %vm392_vm1 }
 0x9c3   :  { %v388_v13 = vsub.f32 1.0, %v387_v12 }
 0x9c5   :  { %v389_v14 = vmul.f32 %v940_v10, %v388_v13 }
 0x9c7   :  { %v390_v15 = vadd.f32 %v940_v10, %v389_v14 }
 0x9c9   :  { %v394_v18 = vsel %vm393_vm3, %v940_v10, %v390_v15 }
 0x9ca   :  { %v399_v21 = vsel %vm396_vm5, %v398_v19, %v394_v18  ;;  %v878_v19 = vld [vmem:[%s1227_s0 + $0x38] sm:$0xff] }
 0x9cb   :  { %v402_v24 = vmul.f32 %v399_v21, %v340_v59 }
 0xa28   :  { %v405_v20 = vpop.permute.xlu0 %404 }
 0xa29   :  { %v407_v22 = vmul.f32 %v405_v20, %v399_v21 }
 0xa2b   :  { %409 = vrot.lane.b32.xlu1 %v407_v22, %s1023_s1 }
 0xa33   :  { %423 = vperm.xlu1 %898, %v872_v23  }
 0xa9d   :  { %v410_v25 = vpop.permute.xlu1 %409 }
 0xa9e   :  { %v412_v26 = vadd.f32 %v410_v25, %v402_v24 }
 0xaa0   :  { %941 = vtanh.f32 %v412_v26 }
 0xaa5   :  { %v424_v31 = vpop.permute.xlu1 %423 }
 0xaa6   :  { %v942_v27 = vpop.eup %941  ;;  %v426_v32 = vmul.f32 %v1085_v8, %v424_v31 }
 0xaa7   :  { %415 = vrot.lane.b32.xlu2 %v942_v27, %s1022_s16 }
 0xb01   :  { %v416_v28 = vpop.permute.xlu2 %415 }
 0xb02   :  { %v418_v29 = vmul.f32 %v416_v28, %v399_v21 }
 0xb04   :  { %428 = vrot.lane.b32.xlu0 %v418_v29, %s1023_s1 }
 0xb76   :  { %v429_v30 = vpop.permute.xlu0 %428 }
 0xb77   :  { %873 = vmatmul.msk.f32.vlgmr.msrb.gmra.mxu1 %vm65_vm4, %v429_v30 }
 0xbf4   :  { %v449_v33 = vpop.f32.mrf.mxu1 }
 0xbf5   :  { %v452_v34 = vadd.f32 %v449_v33, %v426_v32 }
 0xbf7   :  { %v453_v35 = vadd.f32 %v1091_v11, %v452_v34 }
 0xbf9   :  { %943 = vtanh.f32 %v453_v35  ;;  %v874_v37 = vmul.f32 -1.442695, %v453_v35 }
 0xbfb   :  { %945 = vpow2.f32 %v874_v37 }
 0xbff   :  { %v944_v36 = vpop.eup %943 }
 0xc00   :  { %476 = vrot.lane.b32.xlu2 %v944_v36, %s1022_s16 }
 0xc01   :  { %v946_v38 = vpop.eup %945 }
 0xc02   :  { %v457_v39 = vadd.f32 1.0, %v946_v38 }
 0xc04   :  { %947 = vrcp.f32 %v457_v39  ;;  %v469_v45 = vand.u32 2147483648, %v457_v39  ;;  %vm463_vm7 = vweird.f32 %v457_v39  ;;  %v467_v46 = vand.u32 2147483647, %v457_v39 }
 0xc06   :  { %v470_v48 = vor.u32 1.1754944e-38, %v469_v45  ;;  %vm468_vm9 = vcmp.eq.f32.partialorder %v467_v46, 8.507059e+37 }
 0xc0a   :  { %v948_v40 = vpop.eup %947 }
 0xc0b   :  { %v459_v41 = vmul.f32 %v948_v40, %v457_v39  ;;  %vm464_vm6 = vweird.f32 %v948_v40 }
 0xc0c   :  { %vm465_vm8 = vmor %vm463_vm7, %vm464_vm6 }
 0xc0d   :  { %v460_v42 = vsub.f32 1.0, %v459_v41 }
 0xc0f   :  { %v461_v43 = vmul.f32 %v948_v40, %v460_v42 }
 0xc11   :  { %v462_v44 = vadd.f32 %v948_v40, %v461_v43 }
 0xc13   :  { %v466_v47 = vsel %vm465_vm8, %v948_v40, %v462_v44 }
 0xc14   :  { %v471_v50 = vsel %vm468_vm9, %v470_v48, %v466_v47  ;;  %v901_v48 = vld [vmem:[%s1233_s6] ss:$0 sm:$0xff]  ;;  %s1025_s6 = smov 1  }
 0xc15   :  { %v474_v53 = vmul.f32 %v471_v50, %v412_v26 }
 0xc5a   :  { %v477_v49 = vpop.permute.xlu2 %476 }
 0xc5b   :  { %v479_v51 = vmul.f32 %v477_v49, %v471_v50 }
 0xc5d   :  { %481 = vrot.lane.b32.xlu0 %v479_v51, %s1023_s1 }
 0xc65   :  { %495 = vperm.xlu0 %896, %v875_v52  }
 0xccf   :  { %v482_v54 = vpop.permute.xlu0 %481 }
 0xcd0   :  { %v484_v55 = vadd.f32 %v482_v54, %v474_v53 }
 0xcd2   :  { %949 = vtanh.f32 %v484_v55 }
 0xcd7   :  { %v496_v60 = vpop.permute.xlu0 %495 }
 0xcd8   :  { %v950_v56 = vpop.eup %949  ;;  %v498_v61 = vmul.f32 %v1085_v8, %v496_v60  ;;  %v1180_v60 = vld [vmem:[#allocation2] ss:$0 sm:$0xff] }
 0xcd9   :  { %487 = vrot.lane.b32.xlu1 %v950_v56, %s1022_s16 }
 0xd4b   :  { %v488_v57 = vpop.permute.xlu1 %487 }
 0xd4c   :  { %v490_v58 = vmul.f32 %v488_v57, %v471_v50 }
 0xd4e   :  { %500 = vrot.lane.b32.xlu2 %v490_v58, %s1023_s1 }
 0xda8   :  { %v501_v59 = vpop.permute.xlu2 %500 }
 0xda9   :  { %876 = vmatmul.msk.f32.vlgmr.msrb.gmra.mxu2 %vm65_vm4, %v501_v59 }
 0xe2c   :  { %v521_v62 = vpop.f32.mrf.mxu2 }
 0xe2d   :  { %v524_v63 = vadd.f32 %v521_v62, %v498_v61 }
 0xe2f   :  { %v525_v0 = vadd.f32 %v1091_v11, %v524_v63 }
 0xe31   :  { %951 = vtanh.f32 %v525_v0  ;;  %v877_v2 = vmul.f32 -1.442695, %v525_v0 }
 0xe33   :  { %953 = vpow2.f32 %v877_v2 }
 0xe37   :  { %v952_v1 = vpop.eup %951 }
 0xe38   :  { %548 = vrot.lane.b32.xlu1 %v952_v1, %s1022_s16 }
 0xe39   :  { %v954_v3 = vpop.eup %953 }
 0xe3a   :  { %v529_v4 = vadd.f32 1.0, %v954_v3 }
 0xe3c   :  { %955 = vrcp.f32 %v529_v4  ;;  %v541_v12 = vand.u32 2147483648, %v529_v4  ;;  %vm535_vm11 = vweird.f32 %v529_v4  ;;  %v539_v13 = vand.u32 2147483647, %v529_v4 }
 0xe3e   :  { %v542_v15 = vor.u32 1.1754944e-38, %v541_v12  ;;  %vm540_vm13 = vcmp.eq.f32.partialorder %v539_v13, 8.507059e+37 }
 0xe42   :  { %v956_v5 = vpop.eup %955 }
 0xe43   :  { %v531_v6 = vmul.f32 %v956_v5, %v529_v4  ;;  %vm536_vm10 = vweird.f32 %v956_v5 }
 0xe44   :  { %vm537_vm12 = vmor %vm535_vm11, %vm536_vm10 }
 0xe45   :  { %v532_v7 = vsub.f32 1.0, %v531_v6 }
 0xe47   :  { %v533_v9 = vmul.f32 %v956_v5, %v532_v7 }
 0xe49   :  { %v534_v10 = vadd.f32 %v956_v5, %v533_v9 }
 0xe4b   :  { %v538_v14 = vsel %vm537_vm12, %v956_v5, %v534_v10 }
 0xe4c   :  { %v543_v17 = vsel %vm540_vm13, %v542_v15, %v538_v14 }
 0xe4d   :  { %v546_v20 = vmul.f32 %v543_v17, %v484_v55 }
 0xeaa   :  { %v549_v16 = vpop.permute.xlu1 %548 }
 0xeab   :  { %v551_v18 = vmul.f32 %v549_v16, %v543_v17 }
 0xead   :  { %553 = vrot.lane.b32.xlu2 %v551_v18, %s1023_s1 }
 0xeb5   :  { %567 = vperm.xlu2 %897, %v878_v19  }
 0xf07   :  { %v554_v21 = vpop.permute.xlu2 %553 }
 0xf08   :  { %v556_v22 = vadd.f32 %v554_v21, %v546_v20 }
 0xf0a   :  { %957 = vtanh.f32 %v556_v22 }
 0xf0f   :  { %v568_v27 = vpop.permute.xlu2 %567 }
 0xf10   :  { %v958_v23 = vpop.eup %957  ;;  %v570_v28 = vmul.f32 %v1085_v8, %v568_v27 }
 0xf11   :  { %559 = vrot.lane.b32.xlu0 %v958_v23, %s1022_s16 }
 0xf83   :  { %v560_v24 = vpop.permute.xlu0 %559 }
 0xf84   :  { %v562_v25 = vmul.f32 %v560_v24, %v543_v17 }
 0xf86   :  { %572 = vrot.lane.b32.xlu1 %v562_v25, %s1023_s1 }
 0xff8   :  { %v573_v26 = vpop.permute.xlu1 %572 }
 0xff9   :  { %879 = vmatmul.msk.f32.vlgmr.msrb.gmra.mxu3 %vm65_vm4, %v573_v26 }
0x107c   :  { %v593_v29 = vpop.f32.mrf.mxu3 }
0x107d   :  { %v596_v30 = vadd.f32 %v593_v29, %v570_v28 }
0x107f   :  { %v597_v31 = vadd.f32 %v1091_v11, %v596_v30 }
0x1081   :  { %959 = vtanh.f32 %v597_v31  ;;  %v880_v33 = vmul.f32 -1.442695, %v597_v31 }
0x1083   :  { %961 = vpow2.f32 %v880_v33 }
0x1087   :  { %v960_v32 = vpop.eup %959 }
0x1088   :  { %620 = vrot.lane.b32.xlu0 %v960_v32, %s1022_s16 }
0x1089   :  { %v962_v34 = vpop.eup %961 }
0x108a   :  { %v601_v35 = vadd.f32 1.0, %v962_v34 }
0x108c   :  { %963 = vrcp.f32 %v601_v35  ;;  %v613_v41 = vand.u32 2147483648, %v601_v35  ;;  %vm607_vm15 = vweird.f32 %v601_v35  ;;  %v611_v42 = vand.u32 2147483647, %v601_v35 }
0x108e   :  { %v614_v44 = vor.u32 1.1754944e-38, %v613_v41  ;;  %vm612_vm1 = vcmp.eq.f32.partialorder %v611_v42, 8.507059e+37 }
0x1092   :  { %v964_v36 = vpop.eup %963 }
0x1093   :  { %v603_v37 = vmul.f32 %v964_v36, %v601_v35  ;;  %vm608_vm14 = vweird.f32 %v964_v36 }
0x1094   :  { %vm609_vm0 = vmor %vm607_vm15, %vm608_vm14  ;;  %vm846_vm15 = vcmask 7168  }
0x1095   :  { %v604_v38 = vsub.f32 1.0, %v603_v37 }
0x1097   :  { %v605_v39 = vmul.f32 %v964_v36, %v604_v38 }
0x1099   :  { %v606_v40 = vadd.f32 %v964_v36, %v605_v39 }
0x109b   :  { %v610_v43 = vsel %vm609_vm0, %v964_v36, %v606_v40  ;;  %vm848_vm0 = vcmask 15360  }
0x109c   :  { %v615_v46 = vsel %vm612_vm1, %v614_v44, %v610_v43  ;;  %vm850_vm1 = vcmask 23552  }
0x109d   :  { %v618_v49 = vmul.f32 %v615_v46, %v556_v22 }
0x10fa   :  { %v621_v45 = vpop.permute.xlu0 %620 }
0x10fb   :  { %v623_v47 = vmul.f32 %v621_v45, %v615_v46 }
0x10fd   :  { %625 = vrot.lane.b32.xlu1 %v623_v47, %s1023_s1 }
0x1105   :  { %662 = vrot.lane.b32.xlu1 %v901_v48, %s1024_s30 }
0x116f   :  { %v626_v50 = vpop.permute.xlu1 %625 }
0x1170   :  { %v1169_v51 = vadd.f32 %v626_v50, %v618_v49 }
0x1172   :  { %965 = vtanh.f32 %v1169_v51 }
0x1177   :  { %v1173_v54 = vpop.permute.xlu1 %662 }
0x1178   :  { %v966_v52 = vpop.eup %965 }
0x1179   :  { %631 = vrot.lane.b32.xlu2 %v966_v52, %s1022_s16 }
0x11d3   :  { %v632_v53 = vpop.permute.xlu2 %631 }
0x11d4   :  { %v634_v55 = vmul.f32 %v632_v53, %v615_v46 }
0x11d6   :  { %636 = vrot.lane.b32.xlu0 %v634_v55, %s1023_s1  ;;  %v665_v56 = vmul.f32 %v1173_v54, %v634_v55 }
0x11d8   :  { %667 = vrot.lane.b32.xlu2 %v665_v56, %s1023_s1 }
0x1232   :  { %v668_v57 = vpop.permute.xlu2 %667 }
0x1233   :  { %v670_v58 = vsel %vm65_vm4, %v668_v57, 0.0 }
0x1234   :  { %671 = vadd.xlane.f32.xlu0 %v670_v58 }
0x1248   :  { %v637_v59 = vpop.permute.xlu0 %636 }
0x1249   :  { %881 = vmatmul.msk.f32.vlgmr.msra.gmra.mxu0 %vm65_vm4, %v637_v59 }
0x12a7   :  { %v672_v61 = vpop.xlane.xlu0 %671 }
0x12a8   :  { %v1183_v62 = vadd.f32 %v1180_v60, %v672_v61 }
0x12aa   :  { %679 = vperm.xlu1 %898, %v1183_v62  }
0x12c6   :  { %v657_v63 = vpop.f32.mrf.mxu0 }
0x12c7   :  { %v1187_v1 = vadd.f32 %v1091_v11, %v657_v63 }
0x131c   :  { %v680_v0 = vpop.permute.xlu1 %679 }
0x131d   :  { %v682_v2 = vmul.f32 %v1085_v8, %v680_v0 }
0x131f   :  { %v683_v3 = vadd.f32 %v682_v2, %v1187_v1 }
0x1321   :  { %967 = vtanh.f32 %v683_v3  ;;  %v882_v5 = vmul.f32 -1.442695, %v683_v3 }
0x1323   :  { %969 = vpow2.f32 %v882_v5 }
0x1327   :  { %v968_v4 = vpop.eup %967 }
0x1328   :  { %706 = vrot.lane.b32.xlu2 %v968_v4, %s1022_s16 }
0x1329   :  { %v970_v6 = vpop.eup %969 }
0x132a   :  { %v687_v7 = vadd.f32 1.0, %v970_v6 }
0x132c   :  { %971 = vrcp.f32 %v687_v7  ;;  %v699_v11 = vand.u32 2147483648, %v687_v7  ;;  %vm693_vm3 = vweird.f32 %v687_v7  ;;  %v697_v15 = vand.u32 2147483647, %v687_v7 }
0x132e   :  { %v700_v17 = vor.u32 1.1754944e-38, %v699_v11  ;;  %vm698_vm6 = vcmp.eq.f32.partialorder %v697_v15, 8.507059e+37 }
0x1332   :  { %v972_v9 = vpop.eup %971 }
0x1333   :  { %v689_v10 = vmul.f32 %v972_v9, %v687_v7  ;;  %vm694_vm2 = vweird.f32 %v972_v9 }
0x1334   :  { %vm695_vm5 = vmor %vm693_vm3, %vm694_vm2  ;;  %vm852_vm2 = vcmask 31744  }
0x1335   :  { %v690_v12 = vsub.f32 1.0, %v689_v10 }
0x1337   :  { %v691_v13 = vmul.f32 %v972_v9, %v690_v12 }
0x1339   :  { %v692_v14 = vadd.f32 %v972_v9, %v691_v13 }
0x133b   :  { %v696_v16 = vsel %vm695_vm5, %v972_v9, %v692_v14 }
0x133c   :  { %v701_v19 = vsel %vm698_vm6, %v700_v17, %v696_v16 }
0x133d   :  { %v704_v21 = vmul.f32 %v701_v19, %v1169_v51 }
0x1382   :  { %v707_v18 = vpop.permute.xlu2 %706 }
0x1383   :  { %v709_v20 = vmul.f32 %v707_v18, %v701_v19 }
0x1385   :  { %711 = vrot.lane.b32.xlu1 %v709_v20, %s1023_s1 }
0x13f7   :  { %v712_v22 = vpop.permute.xlu1 %711 }
0x13f8   :  { %v714_v23 = vadd.f32 %v712_v22, %v704_v21 }
0x13fa   :  { %973 = vtanh.f32 %v714_v23 }
0x1400   :  { %v974_v24 = vpop.eup %973 }
0x1401   :  { %717 = vrot.lane.b32.xlu2 %v974_v24, %s1022_s16 }
0x145b   :  { %v718_v25 = vpop.permute.xlu2 %717 }
0x145c   :  { %v720_v26 = vmul.f32 %v718_v25, %v701_v19 }
0x145e   :  { %v721_v27 = vmul.f32 %v720_v26, %v1173_v54 }
0x1460   :  { %723 = vrot.lane.b32.xlu1 %v721_v27, %s1023_s1 }
0x14d2   :  { %v724_v28 = vpop.permute.xlu1 %723 }
0x14d3   :  { %v726_v29 = vsel %vm65_vm4, %v724_v28, 0.0 }
0x14d4   :  { %727 = vadd.xlane.f32.xlu2 %v726_v29 }
0x1547   :  { %v728_v30 = vpop.xlane.xlu2 %727 }
0x1548   :  { %v1199_v31 = vadd.f32 %v1180_v60, %v728_v30 }
0x154a   :  { %732 = vperm.xlu1 %898, %v1199_v31  }
0x15bc   :  { %v733_v32 = vpop.permute.xlu1 %732 }
0x15bd   :  { %v735_v33 = vmul.f32 %v1085_v8, %v733_v32 }
0x15bf   :  { %v736_v34 = vadd.f32 %v735_v33, %v1187_v1 }
0x15c1   :  { %975 = vtanh.f32 %v736_v34  ;;  %v883_v36 = vmul.f32 -1.442695, %v736_v34 }
0x15c3   :  { %977 = vpow2.f32 %v883_v36 }
0x15c7   :  { %v976_v35 = vpop.eup %975 }
0x15c8   :  { %759 = vrot.lane.b32.xlu1 %v976_v35, %s1022_s16 }
0x15c9   :  { %v978_v37 = vpop.eup %977 }
0x15ca   :  { %v740_v38 = vadd.f32 1.0, %v978_v37 }
0x15cc   :  { %979 = vrcp.f32 %v740_v38  ;;  %v752_v44 = vand.u32 2147483648, %v740_v38  ;;  %vm746_vm8 = vweird.f32 %v740_v38  ;;  %v750_v45 = vand.u32 2147483647, %v740_v38 }
0x15ce   :  { %v753_v47 = vor.u32 1.1754944e-38, %v752_v44  ;;  %vm751_vm10 = vcmp.eq.f32.partialorder %v750_v45, 8.507059e+37 }
0x15d2   :  { %v980_v39 = vpop.eup %979 }
0x15d3   :  { %v742_v40 = vmul.f32 %v980_v39, %v740_v38  ;;  %vm747_vm7 = vweird.f32 %v980_v39 }
0x15d4   :  { %vm748_vm9 = vmor %vm746_vm8, %vm747_vm7 }
0x15d5   :  { %v743_v41 = vsub.f32 1.0, %v742_v40 }
0x15d7   :  { %v744_v42 = vmul.f32 %v980_v39, %v743_v41 }
0x15d9   :  { %v745_v43 = vadd.f32 %v980_v39, %v744_v42 }
0x15db   :  { %v749_v46 = vsel %vm748_vm9, %v980_v39, %v745_v43 }
0x15dc   :  { %v754_v49 = vsel %vm751_vm10, %v753_v47, %v749_v46 }
0x15dd   :  { %v757_v52 = vmul.f32 %v754_v49, %v1169_v51 }
0x163a   :  { %v760_v48 = vpop.permute.xlu1 %759 }
0x163b   :  { %v762_v50 = vmul.f32 %v760_v48, %v754_v49 }
0x163d   :  { %764 = vrot.lane.b32.xlu1 %v762_v50, %s1023_s1 }
0x16af   :  { %v765_v53 = vpop.permute.xlu1 %764 }
0x16b0   :  { %v767_v55 = vadd.f32 %v765_v53, %v757_v52 }
0x16b2   :  { %981 = vtanh.f32 %v767_v55 }
0x16b8   :  { %v982_v56 = vpop.eup %981 }
0x16b9   :  { %770 = vrot.lane.b32.xlu0 %v982_v56, %s1022_s16 }
0x172b   :  { %v771_v57 = vpop.permute.xlu0 %770 }
0x172c   :  { %v773_v58 = vmul.f32 %v771_v57, %v754_v49 }
0x172e   :  { %v774_v59 = vmul.f32 %v773_v58, %v1173_v54 }
0x1730   :  { %776 = vrot.lane.b32.xlu1 %v774_v59, %s1023_s1 }
0x17a2   :  { %v777_v61 = vpop.permute.xlu1 %776 }
0x17a3   :  { %v779_v63 = vsel %vm65_vm4, %v777_v61, 0.0 }
0x17a4   :  { %780 = vadd.xlane.f32.xlu1 %v779_v63 }
0x1817   :  { %v781_v0 = vpop.xlane.xlu1 %780 }
0x1818   :  { %v782_v2 = vadd.f32 %v1180_v60, %v781_v0 }
0x181a   :  { %785 = vperm.xlu2 %897, %v782_v2  }
0x1874   :  { %v786_v3 = vpop.permute.xlu2 %785 }
0x1875   :  { %v788_v4 = vmul.f32 %v1085_v8, %v786_v3 }
0x1877   :  { %v789_v5 = vadd.f32 %v788_v4, %v1187_v1 }
0x1879   :  { %983 = vtanh.f32 %v789_v5  ;;  %v884_v7 = vmul.f32 -1.442695, %v789_v5 }
0x187b   :  { %985 = vpow2.f32 %v884_v7 }
0x187f   :  { %v984_v6 = vpop.eup %983 }
0x1880   :  { %812 = vrot.lane.b32.xlu0 %v984_v6, %s1022_s16 }
0x1881   :  { %v986_v9 = vpop.eup %985 }
0x1882   :  { %v793_v10 = vadd.f32 1.0, %v986_v9 }
0x1884   :  { %987 = vrcp.f32 %v793_v10  ;;  %v805_v16 = vand.u32 2147483648, %v793_v10  ;;  %vm799_vm12 = vweird.f32 %v793_v10  ;;  %v803_v8 = vand.u32 2147483647, %v793_v10 }
0x1886   :  { %v806_v17 = vor.u32 1.1754944e-38, %v805_v16  ;;  %vm804_vm14 = vcmp.eq.f32.partialorder %v803_v8, 8.507059e+37 }
0x188a   :  { %v988_v12 = vpop.eup %987 }
0x188b   :  { %v795_v13 = vmul.f32 %v988_v12, %v793_v10  ;;  %vm800_vm11 = vweird.f32 %v988_v12 }
0x188c   :  { %vm801_vm13 = vmor %vm799_vm12, %vm800_vm11 }
0x188d   :  { %v796_v14 = vsub.f32 1.0, %v795_v13 }
0x188f   :  { %v797_v11 = vmul.f32 %v988_v12, %v796_v14 }
0x1891   :  { %v798_v15 = vadd.f32 %v988_v12, %v797_v11 }
0x1893   :  { %v802_v1 = vsel %vm801_vm13, %v988_v12, %v798_v15 }
0x1894   :  { %v807_v19 = vsel %vm804_vm14, %v806_v17, %v802_v1 }
0x1895   :  { %v810_v21 = vmul.f32 %v807_v19, %v1169_v51 }
0x18f2   :  { %v813_v18 = vpop.permute.xlu0 %812 }
0x18f3   :  { %v815_v20 = vmul.f32 %v813_v18, %v807_v19 }
0x18f5   :  { %817 = vrot.lane.b32.xlu0 %v815_v20, %s1023_s1 }
0x1967   :  { %v818_v22 = vpop.permute.xlu0 %817 }
0x1968   :  { %v820_v23 = vadd.f32 %v818_v22, %v810_v21 }
0x196a   :  { %989 = vtanh.f32 %v820_v23 }
0x1970   :  { %v990_v24 = vpop.eup %989 }
0x1971   :  { %823 = vrot.lane.b32.xlu0 %v990_v24, %s1022_s16 }
0x19e3   :  { %v824_v25 = vpop.permute.xlu0 %823 }
0x19e4   :  { %v826_v26 = vmul.f32 %v824_v25, %v807_v19 }
0x19e6   :  { %v827_v27 = vmul.f32 %v826_v26, %v1173_v54 }
0x19e8   :  { %829 = vrot.lane.b32.xlu2 %v827_v27, %s1023_s1 }
0x19f0   :  { %836 = vrot.lane.b32.xlu2 %v1199_v31, %s1025_s6 }
0x19f8   :  { %839 = vrot.lane.b32.xlu2 %v782_v2, %s1026_s5 }
0x1a42   :  { %v830_v28 = vpop.permute.xlu2 %829 }
0x1a43   :  { %v832_v51 = vsel %vm65_vm4, %v830_v28, 0.0 }
0x1a44   :  { %833 = vadd.xlane.f32.xlu0 %v832_v51 }
0x1a4a   :  { %v837_v32 = vpop.permute.xlu2 %836 }
0x1a4b   :  { %v847_v33 = vsel %vm846_vm15, %v1183_v62, %v837_v32 }
0x1a52   :  { %v840_v54 = vpop.permute.xlu2 %839 }
0x1a53   :  { %v849_v31 = vsel %vm848_vm0, %v847_v33, %v840_v54 }
0x1ab7   :  { %v834_v29 = vpop.xlane.xlu0 %833 }
0x1ab8   :  { %v835_v30 = vadd.f32 %v1180_v60, %v834_v29 }
0x1aba   :  { %843 = vrot.lane.b32.xlu1 %v835_v30, %s1027_s9 }
0x1b2c   :  { %v844_v34 = vpop.permute.xlu1 %843 }
0x1b2d   :  { %v851_v35 = vsel %vm850_vm1, %v849_v31, %v844_v34 }
0x1b2e   :  { %853 = vst.msk [vmem:[%s1235_s8] sm:$0xff] %vm852_vm2, %v851_v35 }
0x1b2f   :  { %858 = vsyncpa [#allocation4], 1 }

</bundles_post_ra>
